<compile_context>
chip_gen: v7x
topology: tpu7x:2x2x1
jax: 0.10.0
libtpu: 0.0.40
codegen_flags: <defaults>
</compile_context>

<pallas_src>
import functools

import jax
import jax.numpy as jnp
from jax.experimental import pallas as pl
from jax.experimental.pallas import tpu as pltpu


def _round_up(n, m):
    return ((n + m - 1) // m) * m


def policy_kernel(x_ref, w1_ref, b1_ref, w2_ref, b2_ref, w3_ref, b3_ref, out_ref):
    # fc1 + ReLU: bf16 operands on the MXU, f32 accumulate, f32 bias/elementwise.
    h1 = jnp.dot(x_ref[...], w1_ref[...], preferred_element_type=jnp.float32)
    h1 = jnp.maximum(h1 + b1_ref[...], 0.0)
    # fc2 + ReLU
    h2 = jnp.dot(h1.astype(jnp.bfloat16), w2_ref[...],
                 preferred_element_type=jnp.float32)
    h2 = jnp.maximum(h2 + b2_ref[...], 0.0)
    # fc3
    logits = jnp.dot(h2.astype(jnp.bfloat16), w3_ref[...],
                     preferred_element_type=jnp.float32)
    logits = logits + b3_ref[...]
    # softmax over dim=1 (lane axis), all f32, exact normalization.
    m = jnp.max(logits, axis=-1, keepdims=True)
    e = jnp.exp(logits - m)
    denom = jnp.sum(e, axis=-1, keepdims=True)
    out_ref[...] = (e / denom).astype(out_ref.dtype)


def prepare_params(w1, b1, w2, b2, w3, b3):
    """Pad K/hidden to multiples of 128 (lane-dense) and cast matmul operands to bf16.

    Weights are stored [in_features, out_features]; biases are [1, out].
    Zero padding keeps the forward pass bit-for-bit equivalent to the unpadded
    MLP (modulo the deliberate bf16 operand cast).
    """
    K, H = w1.shape
    A = w3.shape[1]
    Kp = _round_up(K, 128)
    Hp = _round_up(H, 128)

    w1p = jnp.zeros((Kp, Hp), jnp.float32).at[:K, :H].set(w1).astype(jnp.bfloat16)
    b1p = jnp.zeros((1, Hp), jnp.float32).at[:, :H].set(b1)
    w2p = jnp.zeros((Hp, Hp), jnp.float32).at[:H, :H].set(w2).astype(jnp.bfloat16)
    b2p = jnp.zeros((1, Hp), jnp.float32).at[:, :H].set(b2)
    w3p = jnp.zeros((Hp, A), jnp.float32).at[:H, :].set(w3).astype(jnp.bfloat16)
    b3p = b3.astype(jnp.float32)
    return (w1p, b1p, w2p, b2p, w3p, b3p)


@functools.partial(jax.jit, static_argnames=("block_b",))
def policy_forward(x, params, block_b=256):
    """x: [B, conv_output_size] f32; params from prepare_params. Returns [B, A] f32."""
    w1, b1, w2, b2, w3, b3 = params
    B, K = x.shape
    Kp, Hp = w1.shape
    A = w3.shape[1]

    # Batch tile: single block for small B, grid over batch for large B.
    # (Cap at 256 rows/tile -> ~320 KB bf16 x-tile, safe on v7x's 64 MiB VMEM.)
    tm = min(block_b, _round_up(B, 8))
    bp = _round_up(B, tm)

    # Zero-pad x: batch -> multiple of tile, features 576 -> 640 (MXU cadence).
    xp = jnp.zeros((bp, Kp), jnp.bfloat16).at[:B, :K].set(x.astype(jnp.bfloat16))

    flops = 2 * bp * (Kp * Hp + Hp * Hp + Hp * A)
    bytes_accessed = (xp.size * 2 + (w1.size + w2.size + w3.size) * 2
                      + (b1.size + b2.size + b3.size) * 4 + bp * A * 4)
    cost = pl.CostEstimate(flops=flops, transcendentals=bp * A,
                           bytes_accessed=bytes_accessed)

    resident = lambda shape: pl.BlockSpec(shape, lambda i: (0, 0))

    out = pl.pallas_call(
        policy_kernel,
        out_shape=jax.ShapeDtypeStruct((bp, A), jnp.float32),
        grid=(bp // tm,),
        in_specs=[
            pl.BlockSpec((tm, Kp), lambda i: (i, 0)),   # x tiles stream over batch
            resident(w1.shape), resident(b1.shape),     # weights/biases stay resident
            resident(w2.shape), resident(b2.shape),
            resident(w3.shape), resident(b3.shape),
        ],
        out_specs=pl.BlockSpec((tm, A), lambda i: (i, 0)),
        compiler_params=pltpu.CompilerParams(
            dimension_semantics=("parallel",),
        ),
        cost_estimate=cost,
    )(xp, w1, b1, w2, b2, w3, b3)
    return out[:B]


def init_params(key, conv_output_size, hidden_size, action_space):
    """Deterministic synthetic parameter init (PyTorch-Linear-like scaling)."""
    ks = jax.random.split(key, 6)

    def linear(kw, kb, fan_in, fan_out):
        bound = 1.0 / jnp.sqrt(fan_in)
        w = jax.random.uniform(kw, (fan_in, fan_out), jnp.float32, -bound, bound)
        b = jax.random.uniform(kb, (1, fan_out), jnp.float32, -bound, bound)
        return w, b

    w1, b1 = linear(ks[0], ks[1], conv_output_size, hidden_size)
    w2, b2 = linear(ks[2], ks[3], hidden_size, hidden_size)
    w3, b3 = linear(ks[4], ks[5], hidden_size, action_space)
    return w1, b1, w2, b2, w3, b3


if __name__ == "__main__":
    # 'data-efficient' architecture -> conv_output_size = 576
    B = 8
    CONV_OUT = 576
    HIDDEN = 32
    ACTION_SPACE = 128

    key = jax.random.PRNGKey(0)
    k_x, k_p = jax.random.split(key)
    x = jax.random.normal(k_x, (B, CONV_OUT), jnp.float32)
    raw = init_params(k_p, CONV_OUT, HIDDEN, ACTION_SPACE)
    params = prepare_params(*raw)

    out = policy_forward(x, params)
    out = jax.block_until_ready(out)
    assert out.shape == (B, ACTION_SPACE)

    # sanity: softmax rows sum to 1 (exact f32 normalization in-kernel)
    row_sums = jnp.sum(out, axis=1)
    assert jnp.allclose(row_sums, jnp.ones((B,), jnp.float32), atol=1e-4), row_sums

    w1, b1, w2, b2, w3, b3 = raw

    # reference with matched bf16-operand / f32-accumulate matmuls
    def mm(a, w):
        return jax.lax.dot_general(
            a.astype(jnp.bfloat16), w.astype(jnp.bfloat16),
            (((1,), (0,)), ((), ())), preferred_element_type=jnp.float32)

    h1 = jax.nn.relu(mm(x, w1) + b1)
    h2 = jax.nn.relu(mm(h1, w2) + b2)
    ref_bf16 = jax.nn.softmax(mm(h2, w3) + b3, axis=1)
    assert jnp.allclose(out, ref_bf16, atol=1e-3), float(jnp.max(jnp.abs(out - ref_bf16)))

    # full-f32 reference (semantics of the original PyTorch module)
    h1f = jax.nn.relu(x @ w1 + b1)
    h2f = jax.nn.relu(h1f @ w2 + b2)
    ref_f32 = jax.nn.softmax(h2f @ w3 + b3, axis=1)
    assert jnp.allclose(out, ref_f32, atol=5e-3), float(jnp.max(jnp.abs(out - ref_f32)))

    print("KERNEL_OK")
</pallas_src>

<mosaic_0001>
module attributes {stable_mosaic.version = 11 : i64} {
  func.func @policy_kernel(%arg0: i32, %arg1: memref<8x640xbf16, #tpu.memory_space<vmem>>, %arg2: memref<640x128xbf16, #tpu.memory_space<vmem>>, %arg3: memref<1x128xf32, #tpu.memory_space<vmem>>, %arg4: memref<128x128xbf16, #tpu.memory_space<vmem>>, %arg5: memref<1x128xf32, #tpu.memory_space<vmem>>, %arg6: memref<128x128xbf16, #tpu.memory_space<vmem>>, %arg7: memref<1x128xf32, #tpu.memory_space<vmem>>, %arg8: memref<8x128xf32, #tpu.memory_space<vmem>>) attributes {dimension_semantics = [#tpu.dimension_semantics<parallel>], iteration_bounds = array<i64: 1>, scalar_prefetch = 0 : i64, scratch_operands = 0 : i64, tpu.core_type = #tpu.core_type<tc>, window_params = [{transform_indices = @transform_0, window_bounds = array<i64: 8, 640>}, {pipeline_mode = #tpu.pipeline_mode<synchronous>, transform_indices = @transform_1, window_bounds = array<i64: 640, 128>}, {pipeline_mode = #tpu.pipeline_mode<synchronous>, transform_indices = @transform_2, window_bounds = array<i64: 1, 128>}, {pipeline_mode = #tpu.pipeline_mode<synchronous>, transform_indices = @transform_3, window_bounds = array<i64: 128, 128>}, {pipeline_mode = #tpu.pipeline_mode<synchronous>, transform_indices = @transform_4, window_bounds = array<i64: 1, 128>}, {pipeline_mode = #tpu.pipeline_mode<synchronous>, transform_indices = @transform_5, window_bounds = array<i64: 128, 128>}, {pipeline_mode = #tpu.pipeline_mode<synchronous>, transform_indices = @transform_6, window_bounds = array<i64: 1, 128>}, {transform_indices = @transform_7, window_bounds = array<i64: 8, 128>}]} {
    %c0 = arith.constant 0 : index
    %c0_0 = arith.constant 0 : index
    %0 = vector.load %arg1[%c0, %c0_0] : memref<8x640xbf16, #tpu.memory_space<vmem>>, vector<8x640xbf16>
    %c0_1 = arith.constant 0 : index
    %c0_2 = arith.constant 0 : index
    %1 = vector.load %arg2[%c0_1, %c0_2] : memref<640x128xbf16, #tpu.memory_space<vmem>>, vector<640x128xbf16>
    %cst = arith.constant dense<0.000000e+00> : vector<8x128xf32>
    %2 = tpu.matmul %0, %1, %cst {dimension_numbers = #tpu.dot_dimension_numbers<[1], [0], [0], [1], [0, 0, 1, 1], [], []>} : vector<8x640xbf16>, vector<640x128xbf16>, vector<8x128xf32> -> vector<8x128xf32>
    %c0_3 = arith.constant 0 : index
    %c0_4 = arith.constant 0 : index
    %3 = vector.load %arg3[%c0_3, %c0_4] : memref<1x128xf32, #tpu.memory_space<vmem>>, vector<1x128xf32>
    %4 = vector.broadcast %3 : vector<1x128xf32> to vector<8x128xf32>
    %5 = arith.addf %2, %4 : vector<8x128xf32>
    %cst_5 = arith.constant 0.000000e+00 : f32
    %6 = vector.broadcast %cst_5 : f32 to vector<8x128xf32>
    %7 = arith.maximumf %5, %6 : vector<8x128xf32>
    %8 = arith.truncf %7 : vector<8x128xf32> to vector<8x128xbf16>
    %c0_6 = arith.constant 0 : index
    %c0_7 = arith.constant 0 : index
    %9 = vector.load %arg4[%c0_6, %c0_7] : memref<128x128xbf16, #tpu.memory_space<vmem>>, vector<128x128xbf16>
    %cst_8 = arith.constant dense<0.000000e+00> : vector<8x128xf32>
    %10 = tpu.matmul %8, %9, %cst_8 {dimension_numbers = #tpu.dot_dimension_numbers<[1], [0], [0], [1], [0, 0, 1, 1], [], []>} : vector<8x128xbf16>, vector<128x128xbf16>, vector<8x128xf32> -> vector<8x128xf32>
    %c0_9 = arith.constant 0 : index
    %c0_10 = arith.constant 0 : index
    %11 = vector.load %arg5[%c0_9, %c0_10] : memref<1x128xf32, #tpu.memory_space<vmem>>, vector<1x128xf32>
    %12 = vector.broadcast %11 : vector<1x128xf32> to vector<8x128xf32>
    %13 = arith.addf %10, %12 : vector<8x128xf32>
    %cst_11 = arith.constant 0.000000e+00 : f32
    %14 = vector.broadcast %cst_11 : f32 to vector<8x128xf32>
    %15 = arith.maximumf %13, %14 : vector<8x128xf32>
    %16 = arith.truncf %15 : vector<8x128xf32> to vector<8x128xbf16>
    %c0_12 = arith.constant 0 : index
    %c0_13 = arith.constant 0 : index
    %17 = vector.load %arg6[%c0_12, %c0_13] : memref<128x128xbf16, #tpu.memory_space<vmem>>, vector<128x128xbf16>
    %cst_14 = arith.constant dense<0.000000e+00> : vector<8x128xf32>
    %18 = tpu.matmul %16, %17, %cst_14 {dimension_numbers = #tpu.dot_dimension_numbers<[1], [0], [0], [1], [0, 0, 1, 1], [], []>} : vector<8x128xbf16>, vector<128x128xbf16>, vector<8x128xf32> -> vector<8x128xf32>
    %c0_15 = arith.constant 0 : index
    %c0_16 = arith.constant 0 : index
    %19 = vector.load %arg7[%c0_15, %c0_16] : memref<1x128xf32, #tpu.memory_space<vmem>>, vector<1x128xf32>
    %20 = vector.broadcast %19 : vector<1x128xf32> to vector<8x128xf32>
    %21 = arith.addf %18, %20 : vector<8x128xf32>
    %cst_17 = arith.constant dense<0xFF800000> : vector<8xf32>
    %22 = vector.multi_reduction <maximumf>, %21, %cst_17 [1] : vector<8x128xf32> to vector<8xf32>
    %23 = vector.shape_cast %22 : vector<8xf32> to vector<8x1xf32>
    %24 = vector.broadcast %23 : vector<8x1xf32> to vector<8x128xf32>
    %25 = arith.subf %21, %24 : vector<8x128xf32>
    %26 = math.exp %25 : vector<8x128xf32>
    %cst_18 = arith.constant dense<0.000000e+00> : vector<8xf32>
    %27 = vector.multi_reduction <add>, %26, %cst_18 [1] : vector<8x128xf32> to vector<8xf32>
    %28 = vector.shape_cast %27 : vector<8xf32> to vector<8x1xf32>
    %29 = vector.broadcast %28 : vector<8x1xf32> to vector<8x128xf32>
    %30 = arith.divf %26, %29 : vector<8x128xf32>
    %c0_19 = arith.constant 0 : index
    %c0_20 = arith.constant 0 : index
    %31 = vector.load %arg8[%c0_19, %c0_20] : memref<8x128xf32, #tpu.memory_space<vmem>>, vector<8x128xf32>
    tpu.vector_store %arg8[%c0_19, %c0_20], %30 {strides = array<i32>} : memref<8x128xf32, #tpu.memory_space<vmem>>, vector<8x128xf32>,
    return
  }
  func.func @transform_0(%arg0: i32) -> (i32, i32) {
    %c0_i32 = arith.constant 0 : i32
    %c0_i32_0 = arith.constant 0 : i32
    return %arg0, %c0_i32 : i32, i32
  }
  func.func @transform_1(%arg0: i32) -> (i32, i32) {
    %c0_i32 = arith.constant 0 : i32
    %c0_i32_0 = arith.constant 0 : i32
    %c0_i32_1 = arith.constant 0 : i32
    return %c0_i32, %c0_i32_0 : i32, i32
  }
  func.func @transform_2(%arg0: i32) -> (i32, i32) {
    %c0_i32 = arith.constant 0 : i32
    %c0_i32_0 = arith.constant 0 : i32
    %c0_i32_1 = arith.constant 0 : i32
    return %c0_i32, %c0_i32_0 : i32, i32
  }
  func.func @transform_3(%arg0: i32) -> (i32, i32) {
    %c0_i32 = arith.constant 0 : i32
    %c0_i32_0 = arith.constant 0 : i32
    %c0_i32_1 = arith.constant 0 : i32
    return %c0_i32, %c0_i32_0 : i32, i32
  }
  func.func @transform_4(%arg0: i32) -> (i32, i32) {
    %c0_i32 = arith.constant 0 : i32
    %c0_i32_0 = arith.constant 0 : i32
    %c0_i32_1 = arith.constant 0 : i32
    return %c0_i32, %c0_i32_0 : i32, i32
  }
  func.func @transform_5(%arg0: i32) -> (i32, i32) {
    %c0_i32 = arith.constant 0 : i32
    %c0_i32_0 = arith.constant 0 : i32
    %c0_i32_1 = arith.constant 0 : i32
    return %c0_i32, %c0_i32_0 : i32, i32
  }
  func.func @transform_6(%arg0: i32) -> (i32, i32) {
    %c0_i32 = arith.constant 0 : i32
    %c0_i32_0 = arith.constant 0 : i32
    %c0_i32_1 = arith.constant 0 : i32
    return %c0_i32, %c0_i32_0 : i32, i32
  }
  func.func @transform_7(%arg0: i32) -> (i32, i32) {
    %c0_i32 = arith.constant 0 : i32
    %c0_i32_0 = arith.constant 0 : i32
    return %arg0, %c0_i32 : i32, i32
  }
}

</mosaic_0001>

<bundles_post_ra>
// kernel: policy_forward.1
= control target key start
LH: loop header
LB: loop body
LE: loop exit
PB: predicated region body
PF: predicated region fallthrough
CT: control target
= control target key end

     0   :  { %12 = vsyncpa [#allocation3], 0  ;;  %s1270_s0 = inlined_call_operand.vmem [shape: bf16[8,640], index: 0, kind: input, shape index: {}]   ;;  %s1271_s1 = inlined_call_operand.hbm [shape: bf16[640,128], index: 1, kind: input, shape index: {}]   ;;  %s1272_s2 = inlined_call_operand.vmem [shape: f32[1,128], index: 2, kind: input, shape index: {}]   ;;  %s1273_s3 = inlined_call_operand.vmem [shape: bf16[128,128], index: 3, kind: input, shape index: {}]   ;;  %s1274_s4 = inlined_call_operand.vmem [shape: f32[1,128], index: 4, kind: input, shape index: {}]   ;;  %s1275_s5 = inlined_call_operand.hbm [shape: bf16[128,128], index: 5, kind: input, shape index: {}]   ;;  %s1276_s6 = inlined_call_operand.vmem [shape: f32[1,128], index: 6, kind: input, shape index: {}]   ;;  %s1277_s7 = inlined_call_operand.hbm [shape: f32[8,128], index: 7, kind: output, shape index: {}]  }
   0x1   :  { %13 = vsyncpa [#allocation6], 0 }
   0x2   :  { %14 = vsyncpa [#allocation4], 0  ;;  %s1115_s24 = smov [#allocation2]   ;;  %s1043_s28 = scalar_lea.hbm %s1271_s1, 5120 }
   0x3   :  { %s22_s25 = sshll.u32 %s1115_s24, 4  ;;  %p1044_p0 = scmp.ne.s32.totalorder %s1271_s1, %s1043_s28  ;;  %s23_s25 = int_to_ptr.vmem [resolvable:$true] %s22_s25 }
   0x4   :  { %p1047_p1 = scmp.lt.u32.totalorder %s1043_s28, %s1271_s1 }
   0x6   :  { %p1049_p2 = pnand %p1047_p1, %p1044_p0 }
   0x8   :  { %1052 = shalt.err (!%p1049_p2)
}
   0x9   :  { %s1053_s10 = scalar_lea.vmem %s23_s25, 5120  ;;  %p1058_p4 = scmp.lt.s32.totalorder %s23_s25, %s23_s25 }
   0xa   :  { %p1054_p3 = scmp.ne.s32.totalorder %s23_s25, %s1053_s10  ;;  %p1059_p5 = scmp.lt.s32.totalorder %s1053_s10, %s1053_s10 }
   0xc   :  { %p1060_p6 = por %p1059_p5, %p1058_p4 }
   0xe   :  { %p1061_p7 = pnand %p1060_p6, %p1054_p3 }
  0x10   :  { %1064 = shalt.err (!%p1061_p7)
}
  0x11   :  { %s1116_s11 = smov 64   ;;  %s1117_s12 = smov 4  }
  0x12   :  { %28 = dma.hbm_to_vmem [thread:$0]  %s1271_s1, 5120, %s23_s25, [#allocation3], %s1116_s11, %s1116_s11, %s1117_s12  }
  0x13   :  { %s1118_s15 = smov [#allocation5]   ;;  %s1065_s19 = scalar_lea.hbm %s1275_s5, 1024 }
  0x14   :  { %s40_s16 = sshll.u32 %s1118_s15, 4  ;;  %p1066_p8 = scmp.ne.s32.totalorder %s1275_s5, %s1065_s19  ;;  %s41_s16 = int_to_ptr.vmem [resolvable:$true] %s40_s16 }
  0x15   :  { %p1069_p9 = scmp.lt.u32.totalorder %s1065_s19, %s1275_s5 }
  0x17   :  { %p1071_p10 = pnand %p1069_p9, %p1066_p8 }
  0x19   :  { %1074 = shalt.err (!%p1071_p10)
}
  0x1a   :  { %s1075_s24 = scalar_lea.vmem %s41_s16, 1024  ;;  %p1080_p12 = scmp.lt.s32.totalorder %s41_s16, %s41_s16 }
  0x1b   :  { %p1076_p11 = scmp.ne.s32.totalorder %s41_s16, %s1075_s24  ;;  %p1081_p13 = scmp.lt.s32.totalorder %s1075_s24, %s1075_s24 }
  0x1d   :  { %p1082_p0 = por %p1081_p13, %p1080_p12 }
  0x1f   :  { %p1083_p1 = pnand %p1082_p0, %p1076_p11 }
  0x21   :  { %1086 = shalt.err (!%p1083_p1)
}
  0x22   :  { %46 = dma.hbm_to_vmem [thread:$0]  %s1275_s5, 1024, %s41_s16, [#allocation6], %s1116_s11, %s1116_s11, %s1117_s12  }
  0x23   :  { %1109 = dma.done.wait [#allocation3], 5120  }
  0x24   :  { %1110 = vsyncadd [#allocation3], 4294962176 }
  0x25   :  { %1111 = dma.done.wait [#allocation6], 1024  }
  0x26   :  { %1112 = vsyncadd [#allocation6], 4294966272  ;;  %v978_v0 = vld [vmem:[#allocation2 + $0x40] sm:$0xff]   ;;  %v982_v4 = vld [vmem:[#allocation2 + $0x48] sm:$0xff]   ;;  %v1119_v35 = vmov 0.0   ;;  %vm1120_vm0 = vmmov 0  }
  0x27   :  { %v979_v1 = vld [vmem:[#allocation2] sm:$0xff]   ;;  %840 = vmatprep.subr.bf16.mxu0 %v978_v0  ;;  %v983_v5 = vld [vmem:[#allocation2 + $0x8] sm:$0xff]   ;;  %v986_v8 = vld [vmem:[#allocation2 + $0x50] sm:$0xff]  }
  0x28   :  { %v980_v2 = vld [vmem:[#allocation2 + $0xc0] sm:$0xff]   ;;  %841 = vmatpush3.bf16.msra.mxu0 %v979_v1  ;;  %v984_v6 = vld [vmem:[#allocation2 + $0xc8] sm:$0xff]   ;;  %v987_v9 = vld [vmem:[#allocation2 + $0x10] sm:$0xff]  }
  0x29   :  { %v981_v3 = vld [vmem:[#allocation2 + $0x80] sm:$0xff]   ;;  %862 = vmatprep.subr.bf16.mxu1 %v980_v2  ;;  %842 = vmatprep.subr.bf16.mxu0 %v982_v4  ;;  %v985_v7 = vld [vmem:[#allocation2 + $0x88] sm:$0xff]   ;;  %v988_v10 = vld [vmem:[#allocation2 + $0xd0] sm:$0xff]  }
  0x2a   :  { %863 = vmatpush3.bf16.msra.mxu1 %v981_v3  ;;  %v989_v11 = vld [vmem:[#allocation2 + $0x90] sm:$0xff]   ;;  %v990_v12 = vld [vmem:[#allocation2 + $0x58] sm:$0xff]   ;;  %v994_v16 = vld [vmem:[#allocation2 + $0x60] sm:$0xff]  }
  0x2b   :  { %864 = vmatprep.subr.bf16.mxu1 %v984_v6  ;;  %v991_v13 = vld [vmem:[#allocation2 + $0x18] sm:$0xff]   ;;  %v995_v17 = vld [vmem:[#allocation2 + $0x20] sm:$0xff]   ;;  %v998_v20 = vld [vmem:[#allocation2 + $0x68] sm:$0xff]  }
  0x2c   :  { %843 = vmatpush3.bf16.msra.mxu0 %v983_v5  ;;  %v992_v14 = vld [vmem:[#allocation2 + $0xd8] sm:$0xff]   ;;  %v996_v18 = vld [vmem:[#allocation2 + $0xe0] sm:$0xff]   ;;  %v999_v21 = vld [vmem:[#allocation2 + $0x28] sm:$0xff]  }
  0x2d   :  { %844 = vmatprep.subr.bf16.mxu0 %v986_v8  ;;  %v993_v15 = vld [vmem:[#allocation2 + $0x98] sm:$0xff]   ;;  %v997_v19 = vld [vmem:[#allocation2 + $0xa0] sm:$0xff]   ;;  %v1000_v22 = vld [vmem:[#allocation2 + $0xe8] sm:$0xff]  }
  0x2e   :  { %865 = vmatpush3.bf16.msra.mxu1 %v985_v7  ;;  %v1001_v23 = vld [vmem:[#allocation2 + $0xa8] sm:$0xff]   ;;  %v1002_v24 = vld [vmem:[#allocation2 + $0x70] sm:$0xff]   ;;  %v1006_v28 = vld [vmem:[#allocation2 + $0x78] sm:$0xff]  }
  0x2f   :  { %866 = vmatprep.subr.bf16.mxu1 %v988_v10  ;;  %v1003_v25 = vld [vmem:[#allocation2 + $0x30] sm:$0xff]   ;;  %v1007_v29 = vld [vmem:[#allocation2 + $0x38] sm:$0xff]   ;;  %v56_v31 = vld [vmem:[%s1270_s0] sm:$0xff] }
  0x30   :  { %845 = vmatpush3.bf16.msra.mxu0 %v987_v9  ;;  %v1004_v26 = vld [vmem:[#allocation2 + $0xf0] sm:$0xff]   ;;  %v1008_v30 = vld [vmem:[#allocation2 + $0xf8] sm:$0xff]   ;;  %v777_v32 = vcombine.low %v56_v31, %v56_v31  ;;  %v778_v33 = vcombine.high %v56_v31, %v56_v31  ;;  %v57_v36 = vld [vmem:[%s1270_s0 + $0x8] sm:$0xff] }
  0x31   :  { %846 = vmatprep.subr.bf16.mxu0 %v990_v12  ;;  %v1005_v27 = vld [vmem:[#allocation2 + $0xb0] sm:$0xff]   ;;  %v1011_v34 = vld [vmem:[#allocation2 + $0xb8] sm:$0xff]   ;;  %v779_v37 = vcombine.low %v57_v36, %v57_v36  ;;  %v780_v38 = vcombine.high %v57_v36, %v57_v36  ;;  %v1014_v39 = vld [vmem:[#allocation2 + $0x100] sm:$0xff]  }
  0x32   :  { %867 = vmatpush3.bf16.msra.mxu1 %v989_v11  ;;  %436 = vmatprep.mubr.bf16.mxu0 %v778_v33  ;;  %v1015_v40 = vld [vmem:[#allocation2 + $0x108] sm:$0xff]   ;;  %v1016_v41 = vld [vmem:[#allocation2 + $0x110] sm:$0xff]   ;;  %v1017_v42 = vld [vmem:[#allocation2 + $0x118] sm:$0xff]  }
  0x33   :  { %868 = vmatprep.subr.bf16.mxu1 %v992_v14  ;;  %476 = vmatprep.mubr.bf16.mxu1 %v780_v38  ;;  %v1018_v43 = vld [vmem:[#allocation2 + $0x120] sm:$0xff]   ;;  %v1019_v44 = vld [vmem:[#allocation2 + $0x128] sm:$0xff]   ;;  %v1020_v45 = vld [vmem:[#allocation2 + $0x130] sm:$0xff]  }
  0x34   :  { %847 = vmatpush3.bf16.msra.mxu0 %v991_v13  ;;  %v1021_v46 = vld [vmem:[#allocation2 + $0x138] sm:$0xff]   ;;  %v1022_v47 = vld [vmem:[%s1270_s0 + $0x10] ss:$0 sps:$4 sm:$0xff]   ;;  %v1023_v48 = vld [vmem:[%s1273_s3] sm:$0xff]  }
  0x35   :  { %848 = vmatprep.subr.bf16.mxu0 %v994_v16  ;;  %v1024_v49 = vld [vmem:[%s1273_s3 + $0x8] sm:$0xff]   ;;  %v1025_v50 = vld [vmem:[%s1273_s3 + $0x10] sm:$0xff]   ;;  %v1026_v51 = vld [vmem:[%s1273_s3 + $0x18] sm:$0xff]  }
  0x36   :  { %869 = vmatpush3.bf16.msra.mxu1 %v993_v15  ;;  %v1027_v52 = vld [vmem:[%s1273_s3 + $0x20] sm:$0xff]   ;;  %v1028_v53 = vld [vmem:[%s1273_s3 + $0x28] sm:$0xff]   ;;  %v1029_v54 = vld [vmem:[%s1273_s3 + $0x30] sm:$0xff]  }
  0x37   :  { %870 = vmatprep.subr.bf16.mxu1 %v996_v18  ;;  %v1030_v55 = vld [vmem:[%s1273_s3 + $0x38] sm:$0xff]   ;;  %v1031_v56 = vld [vmem:[#allocation5] sm:$0xff]   ;;  %v1032_v57 = vld [vmem:[#allocation5 + $0x8] sm:$0xff]  }
  0x38   :  { %849 = vmatpush3.bf16.msra.mxu0 %v995_v17  ;;  %v1033_v58 = vld [vmem:[#allocation5 + $0x10] sm:$0xff]   ;;  %v1034_v59 = vld [vmem:[#allocation5 + $0x18] sm:$0xff]   ;;  %v1035_v60 = vld [vmem:[#allocation5 + $0x20] sm:$0xff]  }
  0x39   :  { %850 = vmatprep.subr.bf16.mxu0 %v998_v20  ;;  %v1036_v61 = vld [vmem:[#allocation5 + $0x28] sm:$0xff]   ;;  %v776_v63 = vld [vmem:[%s1272_s2] ss:$0 sm:$0xff]  ;;  %v1037_v18 = vld [vmem:[#allocation5 + $0x30] sm:$0xff]  }
  0x3a   :  { %871 = vmatpush3.bf16.msra.mxu1 %v997_v19  ;;  %v1038_v19 = vld [vmem:[#allocation5 + $0x38] sm:$0xff]   ;;  %v822_v20 = vld [vmem:[%s1274_s4] ss:$0 sm:$0xff]  ;;  %s1121_s4 = smov [#allocation7]  }
  0x3b   :  { %872 = vmatprep.subr.bf16.mxu1 %v1000_v22  ;;  %s766_s5 = sshll.u32 %s1121_s4, 4  ;;  %s767_s5 = int_to_ptr.vmem [resolvable:$true] %s766_s5 }
  0x3c   :  { %851 = vmatpush3.bf16.msra.mxu0 %v999_v21  ;;  %p1092_p3 = scmp.lt.s32.totalorder %s767_s5, %s767_s5 }
  0x3d   :  { %852 = vmatprep.subr.bf16.mxu0 %v1002_v24 }
  0x3e   :  { %873 = vmatpush3.bf16.msra.mxu1 %v1001_v23 }
  0x3f   :  { %874 = vmatprep.subr.bf16.mxu1 %v1004_v26 }
  0x40   :  { %853 = vmatpush3.bf16.msra.mxu0 %v1003_v25 }
  0x41   :  { %854 = vmatprep.subr.bf16.mxu0 %v1006_v28  ;;  %v831_v28 = vld [vmem:[%s1276_s6] ss:$0 sm:$0xff]  ;;  %s1087_s6 = scalar_lea.vmem %s767_s5, 128 }
  0x42   :  { %875 = vmatpush3.bf16.msra.mxu1 %v1005_v27  ;;  %p1088_p2 = scmp.ne.s32.totalorder %s767_s5, %s1087_s6  ;;  %p1093_p4 = scmp.lt.s32.totalorder %s1087_s6, %s1087_s6 }
  0x43   :  { %876 = vmatprep.subr.bf16.mxu1 %v1008_v30 }
  0x44   :  { %855 = vmatpush3.bf16.msra.mxu0 %v1007_v29  ;;  %p1094_p5 = por %p1093_p4, %p1092_p3 }
  0x45   :  { %911 = vmatprep.subr.bf16.mxu0 %v1119_v35 }
  0x46   :  { %877 = vmatpush3.bf16.msra.mxu1 %v1011_v34  ;;  %p1095_p6 = pnand %p1094_p5, %p1088_p2 }
  0x47   :  { %437 = vmatmul.mubr.bf16.vlgmr.msra.gmra.mrb[0].mxu0 %v777_v32  ;;  %931 = vmatprep.subr.bf16.mxu1 %v1119_v35 }
  0x48   :  { %912 = vmatpush3.bf16.msra.mxu0 %v1014_v39  ;;  %927 = vmatprep.mubr.msk.bf16.mxu0 %vm1120_vm0, %v1119_v35 }
  0x49   :  { %477 = vmatmul.mubr.bf16.vlgmr.msra.gmra.mrb[0].mxu1 %v779_v37  ;;  %913 = vmatprep.subr.bf16.mxu0 %v1119_v35 }
  0x4a   :  { %947 = vmatprep.mubr.msk.bf16.mxu1 %vm1120_vm0, %v1119_v35  ;;  %932 = vmatpush3.bf16.msra.mxu1 %v1023_v48 }
  0x4b   :  { %933 = vmatprep.subr.bf16.mxu1 %v1119_v35 }
  0x4c   :  { %914 = vmatpush3.bf16.msra.mxu0 %v1015_v40 }
  0x4d   :  { %915 = vmatprep.subr.bf16.mxu0 %v1119_v35 }
  0x4e   :  { %934 = vmatpush3.bf16.msra.mxu1 %v1024_v49 }
  0x4f   :  { %935 = vmatprep.subr.bf16.mxu1 %v1119_v35 }
  0x50   :  { %916 = vmatpush3.bf16.msra.mxu0 %v1016_v41 }
  0x51   :  { %917 = vmatprep.subr.bf16.mxu0 %v1119_v35 }
  0x52   :  { %936 = vmatpush3.bf16.msra.mxu1 %v1025_v50 }
  0x53   :  { %937 = vmatprep.subr.bf16.mxu1 %v1119_v35 }
  0x54   :  { %918 = vmatpush3.bf16.msra.mxu0 %v1017_v42 }
  0x55   :  { %919 = vmatprep.subr.bf16.mxu0 %v1119_v35 }
  0x56   :  { %938 = vmatpush3.bf16.msra.mxu1 %v1026_v51 }
  0x57   :  { %939 = vmatprep.subr.bf16.mxu1 %v1119_v35 }
  0x58   :  { %920 = vmatpush3.bf16.msra.mxu0 %v1018_v43 }
  0x59   :  { %921 = vmatprep.subr.bf16.mxu0 %v1119_v35 }
  0x5a   :  { %940 = vmatpush3.bf16.msra.mxu1 %v1027_v52 }
  0x5b   :  { %941 = vmatprep.subr.bf16.mxu1 %v1119_v35 }
  0x5c   :  { %922 = vmatpush3.bf16.msra.mxu0 %v1019_v44 }
  0x5d   :  { %923 = vmatprep.subr.bf16.mxu0 %v1119_v35 }
  0x5e   :  { %942 = vmatpush3.bf16.msra.mxu1 %v1028_v53 }
  0x5f   :  { %943 = vmatprep.subr.bf16.mxu1 %v1119_v35 }
  0x60   :  { %924 = vmatpush3.bf16.msra.mxu0 %v1020_v45 }
  0x61   :  { %925 = vmatprep.subr.bf16.mxu0 %v1119_v35 }
  0x62   :  { %944 = vmatpush3.bf16.msra.mxu1 %v1029_v54 }
  0x63   :  { %945 = vmatprep.subr.bf16.mxu1 %v1119_v35 }
  0x64   :  { %926 = vmatpush3.bf16.msra.mxu0 %v1021_v46 }
  0x65   :  { %951 = vmatprep.subr.bf16.mxu0 %v1119_v35 }
  0x66   :  { %946 = vmatpush3.bf16.msra.mxu1 %v1030_v55 }
  0x67   :  { %928 = vmatmul.mubr.bf16.vlgmr.msra.gmra.mrb[4].mxu0 %v1022_v47 }
  0x68   :  { %967 = vmatprep.mubr.msk.bf16.mxu0 %vm1120_vm0, %v1119_v35  ;;  %952 = vmatpush3.bf16.msra.mxu0 %v1031_v56 }
  0x69   :  { %953 = vmatprep.subr.bf16.mxu0 %v1119_v35 }
  0x6c   :  { %954 = vmatpush3.bf16.msra.mxu0 %v1032_v57 }
  0x6d   :  { %955 = vmatprep.subr.bf16.mxu0 %v1119_v35 }
  0x70   :  { %956 = vmatpush3.bf16.msra.mxu0 %v1033_v58 }
  0x71   :  { %957 = vmatprep.subr.bf16.mxu0 %v1119_v35 }
  0x74   :  { %958 = vmatpush3.bf16.msra.mxu0 %v1034_v59 }
  0x75   :  { %959 = vmatprep.subr.bf16.mxu0 %v1119_v35 }
  0x78   :  { %960 = vmatpush3.bf16.msra.mxu0 %v1035_v60 }
  0x79   :  { %961 = vmatprep.subr.bf16.mxu0 %v1119_v35 }
  0x7c   :  { %962 = vmatpush3.bf16.msra.mxu0 %v1036_v61 }
  0x7d   :  { %963 = vmatprep.subr.bf16.mxu0 %v1119_v35 }
  0x80   :  { %964 = vmatpush3.bf16.msra.mxu0 %v1037_v18 }
  0x81   :  { %965 = vmatprep.subr.bf16.mxu0 %v1119_v35 }
  0x84   :  { %966 = vmatpush3.bf16.msra.mxu0 %v1038_v19 }
 0x11a   :  { %v856_v62 = vpop.f32.mrb[0].mxu0 }
 0x11b   :  { %v857_v0 = vpop.f32.mrb[1].mxu0 }
 0x11c   :  { %v858_v1 = vadd.f32 %v857_v0, %v856_v62  ;;  %v859_v2 = vpop.f32.mrb[2].mxu0  ;;  %v878_v3 = vpop.f32.mrb[0].mxu1 }
 0x11d   :  { %v860_v4 = vpop.f32.mrb[3].mxu0  ;;  %v879_v5 = vpop.f32.mrb[1].mxu1 }
 0x11e   :  { %v439_v6 = vadd.f32 %v858_v1, %v776_v63  ;;  %v880_v7 = vadd.f32 %v879_v5, %v878_v3  ;;  %v881_v8 = vpop.f32.mrb[2].mxu1 }
 0x11f   :  { %v882_v9 = vpop.f32.mrb[3].mxu1 }
 0x120   :  { %v479_v10 = vadd.f32 %v880_v7, %v439_v6 }
 0x13a   :  { %v518_v11 = vpop.f32.mrb[4].mxu0 }
 0x13b   :  { %v519_v12 = vadd.f32 %v518_v11, %v479_v10  ;;  %v929_v13 = vpop.f32.mrb[5].mxu0 }
 0x13c   :  { %v521_v14 = vpop.f32.mrb[6].mxu0 }
 0x13d   :  { %v524_v15 = vmax.f32 %v519_v12, 0.0  ;;  %v930_v16 = vpop.f32.mrb[7].mxu0 }
 0x13f   :  { %v525_v17 = vpack.c.bf16 %v524_v15, %v524_v15 }
 0x141   :  { %948 = vmatmul.mubr.bf16.vlgmr.msra.gmra.mrb[4].mxu1 %v525_v17 }
 0x214   :  { %v631_v21 = vpop.f32.mrb[4].mxu1 }
 0x215   :  { %v632_v22 = vadd.f32 %v822_v20, %v631_v21  ;;  %v949_v23 = vpop.f32.mrb[5].mxu1 }
 0x216   :  { %v634_v24 = vpop.f32.mrb[6].mxu1 }
 0x217   :  { %v637_v25 = vmax.f32 %v632_v22, 0.0  ;;  %v950_v26 = vpop.f32.mrb[7].mxu1 }
 0x219   :  { %v638_v27 = vpack.c.bf16 %v637_v25, %v637_v25 }
 0x21b   :  { %968 = vmatmul.mubr.bf16.vlgmr.msra.gmra.mrb[8].mxu0 %v638_v27 }
 0x2ee   :  { %v744_v29 = vpop.f32.mrb[8].mxu0 }
 0x2ef   :  { %v745_v30 = vadd.f32 %v831_v28, %v744_v29  ;;  %v969_v31 = vpop.f32.mrb[9].mxu0 }
 0x2f0   :  { %v747_v32 = vpop.f32.mrb[10].mxu0 }
 0x2f1   :  { %750 = vmax.xlane.f32.xlu0 %v745_v30  ;;  %v970_v33 = vpop.f32.mrb[11].mxu0 }
 0x37e   :  { %v751_v34 = vpop.xlane.xlu0 %750 }
 0x37f   :  { %v752_v35 = vsub.f32 %v745_v30, %v751_v34 }
 0x381   :  { %v753_v36 = vmul.f32 1.442695, %v752_v35 }
 0x383   :  { %1039 = vpow2.f32 %v753_v36 }
 0x38d   :  { %v1040_v37 = vpop.eup %1039 }
 0x38e   :  { %755 = vadd.xlane.f32.xlu0 %v1040_v37 }
 0x41b   :  { %v756_v38 = vpop.xlane.xlu0 %755 }
 0x41c   :  { %1041 = vrcp.f32 %v756_v38 }
 0x426   :  { %v1042_v39 = vpop.eup %1041 }
 0x427   :  { %v758_v40 = vmul.f32 %v1042_v39, %v1040_v37 }
 0x429   :  { %759 = vst [vmem:[#allocation7] sm:$0xff] %v758_v40 }
 0x42a   :  { %1098 = shalt.err (!%p1095_p6)
}
 0x42b   :  { %s1099_s28 = scalar_lea.hbm %s1277_s7, 128 }
 0x42c   :  { %p1100_p7 = scmp.ne.s32.totalorder %s1277_s7, %s1099_s28  ;;  %p1103_p8 = scmp.lt.u32.totalorder %s1099_s28, %s1277_s7 }
 0x42e   :  { %p1105_p9 = pnand %p1103_p8, %p1100_p7 }
 0x430   :  { %1108 = shalt.err (!%p1105_p9)
}
 0x431   :  { %769 = dma.vmem_to_hbm [thread:$0]  %s767_s5, 128, %s1277_s7, [#allocation4]  }
 0x432   :  { %1113 = dma.done.wait [#allocation4], 128  }
 0x433   :  { %1114 = vsyncadd [#allocation4], 4294967168 }
 0x434   :  { %773 = vsyncpa [#allocation3], 1 }
 0x435   :  { %774 = vsyncpa [#allocation6], 1 }
 0x436   :  { %775 = vsyncpa [#allocation4], 1 }

</bundles_post_ra>
